<compile_context>
chip_gen: v6e
topology: v6e:2x2x1
jax: 0.10.0
libtpu: 0.0.40
codegen_flags: <defaults>
</compile_context>

<pallas_src>
import functools

import jax
import jax.numpy as jnp
import numpy as np
from jax import lax
from jax.experimental import pallas as pl
from jax.experimental.pallas import tpu as pltpu


def _fused_conv1x1_bn_lif_kernel(x_ref, w_ref, b_ref, vinit_ref, out_ref, *, alpha):
    # x_ref:     (nb, C_in,  tile_m)  f32   pixel tile, channels on sublanes, pixels on lanes
    # w_ref:     (C_out, C_in)        bf16  conv weight with BN scale and 1/tau folded in
    # b_ref:     (C_out, 1)           f32   BN shift / tau
    # vinit_ref: (nb, C_out, tile_m)  f32   initial membrane potential tile
    # out_ref:   (nb, C_out, tile_m)  f32   membrane potential v
    w = w_ref[...]
    b = b_ref[...]
    nb = x_ref.shape[0]
    for i in range(nb):  # static, tiny batch block -> unrolled
        xb = x_ref[i].astype(jnp.bfloat16)  # cast in VMEM, right before the MXU dot
        y = jnp.dot(w, xb, preferred_element_type=jnp.float32)
        out_ref[i] = y + b + alpha * vinit_ref[i]


def temporal_flat_layer_concat(x_nchw, v_init_nchw, weight_oihw,
                               gamma, beta, running_mean, running_var,
                               *, tau=2.0, eps=1e-5, tile_m=8192):
    N, C_in, H, W = x_nchw.shape
    C_out, C_in_w, KH, KW = weight_oihw.shape
    assert (KH, KW) == (1, 1) and C_in_w == C_in, "module uses a 1x1 conv"
    HW = H * W

    # ---- Fold BatchNorm (eval mode) and the LIF algebra (exact rewrite, tau > 0) ----
    #   bn(conv(x)) = scale * (w @ x) + shift                       per output channel
    #   v           = (1 - 1/tau) * v_init + (scale/tau) * (w @ x) + shift/tau
    inv_std = 1.0 / jnp.sqrt(running_var.astype(jnp.float32) + eps)
    scale = gamma.astype(jnp.float32) * inv_std
    shift = beta.astype(jnp.float32) - running_mean.astype(jnp.float32) * scale
    w2d = weight_oihw.reshape(C_out, C_in).astype(jnp.float32)
    w_fused = (w2d * scale[:, None]) * (1.0 / tau)            # (C_out, C_in)
    b_fused = (shift * (1.0 / tau)).reshape(C_out, 1)         # (C_out, 1)
    alpha = 1.0 - 1.0 / tau

    # ---- Channels-first, f32 straight from HBM: only free reshapes ----
    x = x_nchw.reshape(N, C_in, HW)
    v_init = v_init_nchw.reshape(N, C_out, HW)

    # ---- Tiling: lane-dense (multiple of 128), big enough to amortize per-step overhead ----
    tile_m = int(tile_m)
    tile_m = max(128, (tile_m // 128) * 128)
    tile_m = min(tile_m, 128 * pl.cdiv(HW, 128))     # no bigger than the 128-rounded extent
    grid_m = pl.cdiv(HW, tile_m)                     # ragged last tile handled by Pallas masking

    # v7x has 2 TensorCores: keep >= 2 parallel grid steps when the problem allows.
    if N * grid_m < 2 and tile_m > 128:
        tile_m = max(128, 128 * pl.cdiv(pl.cdiv(HW, 2), 128))
        grid_m = pl.cdiv(HW, tile_m)

    # Fold several batch elements into one step for small spatial extents (~2 MiB per step).
    per_pixel_bytes = 4 * (C_in + 2 * C_out)         # f32 x + v_init reads, f32 v write
    target_step_bytes = 2 << 20
    nb = max(1, min(N, target_step_bytes // max(1, tile_m * per_pixel_bytes)))
    while nb > 1 and pl.cdiv(N, nb) * grid_m < 2:    # but keep both TensorCores busy
        nb //= 2
    nb = max(1, nb)
    grid_n = pl.cdiv(N, nb)

    kernel = functools.partial(_fused_conv1x1_bn_lif_kernel, alpha=float(alpha))

    cost = pl.CostEstimate(
        flops=2 * N * HW * C_in * C_out,
        transcendentals=0,
        bytes_accessed=int(N * HW * per_pixel_bytes + w_fused.size * 2 + b_fused.size * 4),
    )

    out = pl.pallas_call(
        kernel,
        out_shape=jax.ShapeDtypeStruct((N, C_out, HW), jnp.float32),
        grid_spec=pltpu.PrefetchScalarGridSpec(
            num_scalar_prefetch=0,
            grid=(grid_n, grid_m),
            in_specs=[
                pl.BlockSpec((nb, C_in, tile_m), lambda n, m: (n, 0, m)),    # x tile (f32)
                pl.BlockSpec((C_out, C_in), lambda n, m: (0, 0)),            # fused weight (bf16)
                pl.BlockSpec((C_out, 1), lambda n, m: (0, 0)),               # fused bias (f32)
                pl.BlockSpec((nb, C_out, tile_m), lambda n, m: (n, 0, m)),   # v_init tile (f32)
            ],
            out_specs=pl.BlockSpec((nb, C_out, tile_m), lambda n, m: (n, 0, m)),
        ),
        compiler_params=pltpu.CompilerParams(
            dimension_semantics=("parallel", "parallel")),
        cost_estimate=cost,
    )(x, w_fused.astype(jnp.bfloat16), b_fused, v_init)

    return out.reshape(N, C_out, H, W)


def _reference(x, v_init, w, gamma, beta, rm, rv, *, tau, eps):
    y = lax.conv_general_dilated(
        x.astype(jnp.float32), w.astype(jnp.float32),
        window_strides=(1, 1), padding="VALID",
        dimension_numbers=("NCHW", "OIHW", "NCHW"))
    bcast = lambda a: a[None, :, None, None]
    y = (y - bcast(rm)) / jnp.sqrt(bcast(rv) + eps) * bcast(gamma) + bcast(beta)
    return v_init + (y - v_init) / tau     # Mp LIF node: v_threshold=inf -> returns v


if __name__ == "__main__":
    # Small shapes consistent with the module: Conv2d(64, 13, 1, bias=False).
    N, C_in, C_out, H, W = 2, 64, 13, 16, 16
    tau, eps = 2.0, 1e-5

    key = jax.random.PRNGKey(0)
    kx, kv, kw, kg, kb, km, ks = jax.random.split(key, 7)

    x = jax.random.normal(kx, (N, C_in, H, W), dtype=jnp.float32)
    v_init = 0.5 * jax.random.normal(kv, (N, C_out, H, W), dtype=jnp.float32)

    # Deterministic synthetic parameters (no checkpoint).
    fan_in = C_in
    weight = jax.random.uniform(kw, (C_out, C_in, 1, 1), dtype=jnp.float32,
                                minval=-1.0, maxval=1.0) / np.sqrt(fan_in)
    gamma = 1.0 + 0.1 * jax.random.normal(kg, (C_out,), dtype=jnp.float32)
    beta = 0.1 * jax.random.normal(kb, (C_out,), dtype=jnp.float32)
    running_mean = 0.1 * jax.random.normal(km, (C_out,), dtype=jnp.float32)
    running_var = 1.0 + 0.1 * jax.random.uniform(ks, (C_out,), dtype=jnp.float32)

    v_out = temporal_flat_layer_concat(
        x, v_init, weight, gamma, beta, running_mean, running_var, tau=tau, eps=eps)
    v_out = jax.block_until_ready(v_out)

    ref = _reference(x, v_init, weight, gamma, beta, running_mean, running_var,
                     tau=tau, eps=eps)

    assert v_out.shape == (N, C_out, H, W), v_out.shape
    max_err = float(jnp.max(jnp.abs(v_out - ref)))
    mean_err = float(jnp.mean(jnp.abs(v_out - ref)))
    assert max_err < 5e-2 and mean_err < 5e-3, (max_err, mean_err)

    print("KERNEL_OK")
</pallas_src>

<mosaic_0001>
module attributes {stable_mosaic.version = 11 : i64} {
  func.func @_fused_conv1x1_bn_lif_kernel(%arg0: i32, %arg1: i32, %arg2: memref<1x64x256xf32, #tpu.memory_space<vmem>>, %arg3: memref<13x64xbf16, #tpu.memory_space<vmem>>, %arg4: memref<13x1xf32, #tpu.memory_space<vmem>>, %arg5: memref<1x13x256xf32, #tpu.memory_space<vmem>>, %arg6: memref<1x13x256xf32, #tpu.memory_space<vmem>>) attributes {dimension_semantics = [#tpu.dimension_semantics<parallel>, #tpu.dimension_semantics<parallel>], iteration_bounds = array<i64: 2, 1>, scalar_prefetch = 0 : i64, scratch_operands = 0 : i64, tpu.core_type = #tpu.core_type<tc>, window_params = [{transform_indices = @transform_0, window_bounds = array<i64: 1, 64, 256>}, {pipeline_mode = #tpu.pipeline_mode<synchronous>, transform_indices = @transform_1, window_bounds = array<i64: 13, 64>}, {pipeline_mode = #tpu.pipeline_mode<synchronous>, transform_indices = @transform_2, window_bounds = array<i64: 13, 1>}, {transform_indices = @transform_3, window_bounds = array<i64: 1, 13, 256>}, {transform_indices = @transform_4, window_bounds = array<i64: 1, 13, 256>}]} {
    %c0 = arith.constant 0 : index
    %c0_0 = arith.constant 0 : index
    %0 = vector.load %arg3[%c0, %c0_0] : memref<13x64xbf16, #tpu.memory_space<vmem>>, vector<13x64xbf16>
    %c0_1 = arith.constant 0 : index
    %c0_2 = arith.constant 0 : index
    %1 = vector.load %arg4[%c0_1, %c0_2] : memref<13x1xf32, #tpu.memory_space<vmem>>, vector<13x1xf32>
    %c0_3 = arith.constant 0 : index
    %c0_4 = arith.constant 0 : index
    %c0_5 = arith.constant 0 : index
    %2 = vector.load %arg2[%c0_3, %c0_4, %c0_5] : memref<1x64x256xf32, #tpu.memory_space<vmem>>, vector<1x64x256xf32>
    %3 = vector.shape_cast %2 : vector<1x64x256xf32> to vector<64x256xf32>
    %4 = arith.truncf %3 : vector<64x256xf32> to vector<64x256xbf16>
    %cst = arith.constant dense<0.000000e+00> : vector<13x256xf32>
    %5 = tpu.matmul %0, %4, %cst {dimension_numbers = #tpu.dot_dimension_numbers<[1], [0], [0], [1], [0, 0, 1, 1], [], []>} : vector<13x64xbf16>, vector<64x256xbf16>, vector<13x256xf32> -> vector<13x256xf32>
    %6 = vector.broadcast %1 : vector<13x1xf32> to vector<13x256xf32>
    %7 = arith.addf %5, %6 : vector<13x256xf32>
    %c0_6 = arith.constant 0 : index
    %c0_7 = arith.constant 0 : index
    %c0_8 = arith.constant 0 : index
    %8 = vector.load %arg5[%c0_6, %c0_7, %c0_8] : memref<1x13x256xf32, #tpu.memory_space<vmem>>, vector<1x13x256xf32>
    %9 = vector.shape_cast %8 : vector<1x13x256xf32> to vector<13x256xf32>
    %cst_9 = arith.constant 5.000000e-01 : f32
    %10 = vector.broadcast %cst_9 : f32 to vector<13x256xf32>
    %11 = arith.mulf %10, %9 : vector<13x256xf32>
    %12 = arith.addf %7, %11 : vector<13x256xf32>
    %c0_10 = arith.constant 0 : index
    %c0_11 = arith.constant 0 : index
    %c0_12 = arith.constant 0 : index
    %13 = vector.load %arg6[%c0_10, %c0_11, %c0_12] : memref<1x13x256xf32, #tpu.memory_space<vmem>>, vector<1x13x256xf32>
    %14 = vector.shape_cast %13 : vector<1x13x256xf32> to vector<13x256xf32>
    %15 = vector.shape_cast %12 : vector<13x256xf32> to vector<1x13x256xf32>
    tpu.vector_store %arg6[%c0_10, %c0_11, %c0_12], %15 {strides = array<i32>} : memref<1x13x256xf32, #tpu.memory_space<vmem>>, vector<1x13x256xf32>,
    return
  }
  func.func @transform_0(%arg0: i32, %arg1: i32) -> (i32, i32, i32) {
    %c0_i32 = arith.constant 0 : i32
    %c0_i32_0 = arith.constant 0 : i32
    return %arg0, %c0_i32, %arg1 : i32, i32, i32
  }
  func.func @transform_1(%arg0: i32, %arg1: i32) -> (i32, i32) {
    %c0_i32 = arith.constant 0 : i32
    %c0_i32_0 = arith.constant 0 : i32
    %c0_i32_1 = arith.constant 0 : i32
    return %c0_i32, %c0_i32_0 : i32, i32
  }
  func.func @transform_2(%arg0: i32, %arg1: i32) -> (i32, i32) {
    %c0_i32 = arith.constant 0 : i32
    %c0_i32_0 = arith.constant 0 : i32
    %c0_i32_1 = arith.constant 0 : i32
    return %c0_i32, %c0_i32_0 : i32, i32
  }
  func.func @transform_3(%arg0: i32, %arg1: i32) -> (i32, i32, i32) {
    %c0_i32 = arith.constant 0 : i32
    %c0_i32_0 = arith.constant 0 : i32
    return %arg0, %c0_i32, %arg1 : i32, i32, i32
  }
  func.func @transform_4(%arg0: i32, %arg1: i32) -> (i32, i32, i32) {
    %c0_i32 = arith.constant 0 : i32
    %c0_i32_0 = arith.constant 0 : i32
    return %arg0, %c0_i32, %arg1 : i32, i32, i32
  }
}

</mosaic_0001>

<bundles_post_ra>
// kernel: tpu_custom_call.1
= control target key start
LH: loop header
LB: loop body
LE: loop exit
PB: predicated region body
PF: predicated region fallthrough
CT: control target
= control target key end

     0   :  { %9 = vsyncpa [#allocation3], 0  ;;  %s817_s0 = inlined_call_operand.hbm [shape: f32[2,64,256], index: 0, kind: input, shape index: {}]   ;;  %s818_s1 = inlined_call_operand.vmem [shape: bf16[13,64], index: 1, kind: input, shape index: {}]   ;;  %s819_s2 = inlined_call_operand.vmem [shape: f32[13,1], index: 2, kind: input, shape index: {}]   ;;  %s820_s3 = inlined_call_operand.vmem [shape: f32[2,13,256], index: 3, kind: input, shape index: {}]   ;;  %s821_s4 = inlined_call_operand.vmem [shape: f32[2,13,256], index: 4, kind: output, shape index: {}]  }
   0x1   :  { %11 = vsyncpa [#allocation3 + $0x1], 0  ;;  %s691_s15 = smov 0   ;;  %s693_s16 = smov 0  }
   0x2   :  { %s695_s17 = smov 0   ;;  %s697_s18 = smov 0  }
   0x3   :  { %s699_s19 = smov 0   ;;  %s701_s20 = smov 0  }
   0x4 LB: > { %s502_s21 = sadd.s32 4294967295, %s660_s20   ;;  %s29_s22 = sadd.s32 1, %s656_s19  ;;  %s660_s20 = sphi %s701_s20, %s17_s20   ;;  %s656_s19 = sphi %s699_s19, %s829_s19   ;;  %s652_s18 = sphi %s697_s18, %s828_s18   ;;  %s648_s17 = sphi %s695_s17, %s827_s17   ;;  %s644_s16 = sphi %s693_s16, %s826_s16   ;;  %s640_s15 = sphi %s691_s15, %s825_s15  }
   0x5   : > { %p31_p0 = scmp.ge.s32.totalorder %s29_s22, 2  ;;  %s38_s23 = sadd.s32 1, %s648_s17 }
   0x6   : > { %p45_p1 = scmp.ne.s32.totalorder %s648_s17, %s644_s16  ;;  %p46_p2 = scmp.eq.s32.totalorder %s660_s20, 0 }
   0x7   : > { %s831_s22 = smov (%p31_p0, %s29_s22), 0  ;;  %p51_p4 = scmp.ne.s32.totalorder %s644_s16, %s640_s15 }
   0x8   : > { %p727_p3 = por %p46_p2, %p45_p1  ;;  %s33_s25 = ssub.s32 %s656_s19, %s831_s22 }
   0x9   : > { %p52_p5 = scmp.eq.s32.totalorder %s502_s21, 0  ;;  %p36_p6 = scmp.eq.s32.totalorder %s33_s25, 0 }
   0xa   : > { %p528_p8 = scmp.lt.s32.totalorder %s660_s20, 2  ;;  %s179_s28 = sand.u32 1, %s648_s17  }
   0xb   : > { %p734_p7 = por %p52_p5, %p51_p4  ;;  %s519_s29 = sshll.u32 %s656_s19, 11 }
   0xc   : > { %s740_s27 = scalar_select %p36_p6, %s648_s17, %s38_s23  }
   0xd   : > { %s506_s30 = sshll.u32 %s179_s28, 7  ;;  %s191_s7 = scalar_lea.hbm %s817_s0, %s519_s29 }
   0xe   : > { %s183_s8 = scalar_lea.vmem [#allocation2], %s506_s30  ;;  %p749_p9 = pnand %p528_p8, %p727_p3 }
   0xf   : > { %s192_s9 = sshll.u32 %s183_s8, 4  ;;  %s180_s11 = scalar_lea.sflag [#allocation3], %s179_s28  ;;  %s193_s9 = int_to_ptr.vmem [resolvable:$true] %s192_s9 }
  0x10   : > { %p584_p10 = pneg %p749_p9  ;;  %s595_s12 = scalar_lea.vmem %s193_s9, 2048 }
  0x11   : > { %p596_p11 = scmp.ne.s32.totalorder %s193_s9, %s595_s12  ;;  %s662_s13 = smov [#allocation2]  }
  0x12   : > { %s600_s14 = sshll.u32 %s662_s13, 4  ;;  %s601_s14 = int_to_ptr.vmem [resolvable:$false] %s600_s14 }
  0x13   : > { %p598_p12 = pnand %p596_p11, %p584_p10  ;;  %s602_s15 = scalar_lea.vmem %s601_s14, 4096 }
  0x14   : > { %p603_p0 = scmp.lt.s32.totalorder %s193_s9, %s601_s14  ;;  %p604_p1 = scmp.lt.s32.totalorder %s602_s15, %s595_s12 }
  0x15   : > { %p599_p13 = pneg %p598_p12 }
  0x16   : > { %p605_p2 = por %p604_p1, %p603_p0 }
  0x18   : > { %p606_p3 = pnand %p605_p2, %p599_p13 }
  0x1a   : > { %609 = shalt.err (!%p606_p3)
}
  0x1b   : > { %s663_s21 = smov 256   ;;  %s664_s23 = smov 16  }
  0x1c   : > { %527 = dma.hbm_to_vmem [thread:$0]  (!%p749_p9), %s191_s7, 2048, %s193_s9, %s180_s11, %s663_s21, %s663_s21, %s664_s23  }
  0x1d   : > { %p509_p4 = scmp.ge.s32.totalorder %s660_s20, 1  ;;  %p213_p5 = scmp.lt.s32.totalorder %s660_s20, 3 }
  0x1f   : > { %p214_p6 = pnand %p509_p4, %p213_p5 }
  0x20   : > { %s219_s24 = sand.u32 (!%p214_p6), 1, %s644_s16  }
  0x21   : > { %217 = sbr.rel (%p214_p6) target bundleno = 262 (0x106), region = 36  ;;  %s510_s25 = sshll.u32 (!%p214_p6), %s219_s24, 7 }
  0x22   : > { %s220_s28 = scalar_lea.sflag (!%p214_p6), [#allocation3], %s219_s24  ;;  %s760_s29 = scalar_lea.vmem (!%p214_p6), [#allocation2], %s510_s25 }
  0x26   : > { %635 = dma.done.wait (%p734_p7), %s220_s28, 2048  }
  0x27   : > { %637 = vsyncadd (%p734_p7), %s220_s28, 4294965248  ;;  %v665_v0 = vmov 0   ;;  %v300_v1 = vld [vmem:[%s760_s29 + $0x68] sm:$0xff]  ;;  %v302_v2 = vld [vmem:[%s760_s29 + $0x78] sm:$0xff]  ;;  %vm326_vm0 = vcmask 523264   ;;  %p263_p7 = scmp.lt.s32.totalorder %s652_s18, 1 }
  0x28   : > { %362 = vmatprep.mubr.bf16.mxu0 %v665_v0  ;;  %580 = vset.pattern.permute.xlu0 %v665_v0  ;;  %v299_v3 = vld [vmem:[%s760_s29 + $0x60] sm:$0xff]  ;;  %v310_v4 = vpack.c.bf16 %v302_v2, %v300_v1  ;;  %v301_v5 = vld [vmem:[%s760_s29 + $0x70] sm:$0xff]  ;;  %v296_v6 = vld [vmem:[%s760_s29 + $0x48] sm:$0xff] }
  0x29   : > { %v298_v7 = vld [vmem:[%s760_s29 + $0x58] sm:$0xff]  ;;  %v309_v8 = vpack.c.bf16 %v301_v5, %v299_v3  ;;  %v295_v10 = vld [vmem:[%s760_s29 + $0x40] sm:$0xff]  ;;  %v297_v11 = vld [vmem:[%s760_s29 + $0x50] sm:$0xff]  ;;  %s833_s18 = smov (!%p263_p7, %s652_s18), 1 }
  0x2a   : > { %v308_v9 = vpack.c.bf16 %v298_v7, %v296_v6  ;;  %v292_v12 = vld [vmem:[%s760_s29 + $0x28] sm:$0xff]  ;;  %338 = vmatprep.subr.bf16.mxu0 %v310_v4  ;;  %v294_v13 = vld [vmem:[%s760_s29 + $0x38] sm:$0xff]  ;;  %v307_v14 = vpack.c.bf16 %v297_v11, %v295_v10  ;;  %v291_v15 = vld [vmem:[%s760_s29 + $0x20] sm:$0xff]  ;;  %s520_s9 = sshll.u32 %s833_s18, 5 }
  0x2b   : > { %339 = vmatpush1.bf16.msra.mxu0 %v309_v8  ;;  %v306_v16 = vpack.c.bf16 %v294_v13, %v292_v12  ;;  %v293_v17 = vld [vmem:[%s760_s29 + $0x30] sm:$0xff]  ;;  %v288_v18 = vld [vmem:[%s760_s29 + $0x8] sm:$0xff]  ;;  %v290_v19 = vld [vmem:[%s760_s29 + $0x18] sm:$0xff]  ;;  %s270_s12 = scalar_lea.vmem %s820_s3, %s520_s9  ;;  %s280_s15 = scalar_lea.vmem %s821_s4, %s520_s9 }
  0x2c   : > { %340 = vmatprep.subr.bf16.mxu0 %v308_v9  ;;  %v285_v20 = vld [vmem:[%s819_s2] sm:$0xff]  ;;  %v305_v21 = vpack.c.bf16 %v293_v17, %v291_v15  ;;  %v286_v22 = vld [vmem:[%s819_s2 + $0x8] sm:$0x1f]  ;;  %v304_v23 = vpack.c.bf16 %v290_v19, %v288_v18  ;;  %v289_v25 = vld [vmem:[%s760_s29 + $0x10] sm:$0xff] }
  0x2d   : > { %313 = vperm.xlu0 %580, %v285_v20   ;;  %v287_v24 = vld [vmem:[%s760_s29] sm:$0xff]  ;;  %v374_v30 = vld [vmem:[%s270_s12 + $0x8] sm:$0xff]  ;;  %v375_v33 = vld [vmem:[%s270_s12 + $0x10] sm:$0x1f] }
  0x2e   : > { %v303_v26 = vpack.c.bf16 %v289_v25, %v287_v24  ;;  %v581_v27 = vld [vmem:[%s818_s1] sm:$0x7f]   ;;  %v378_v35 = vmul.f32 0.5, %v374_v30  ;;  %v376_v37 = vld [vmem:[%s270_s12 + $0x18] sm:$0x1f]  ;;  %v379_v40 = vmul.f32 0.5, %v375_v33 }
  0x2f   : > { %341 = vmatpush1.bf16.msra.mxu0 %v307_v14  ;;  %v373_v28 = vld [vmem:[%s270_s12] sm:$0xff]  ;;  %v380_v45 = vmul.f32 0.5, %v376_v37 }
  0x30   : > { %342 = vmatprep.subr.bf16.mxu0 %v306_v16  ;;  %v377_v31 = vmul.f32 0.5, %v373_v28 }
  0x31   : > { %318 = vperm.xlu0 %580, %v286_v22  }
  0x33   : > { %343 = vmatpush1.bf16.msra.mxu0 %v305_v21 }
  0x34   : > { %344 = vmatprep.subr.bf16.mxu0 %v304_v23 }
  0x37   : > { %345 = vmatpush1.bf16.msra.mxu0 %v303_v26 }
  0x3a   : > { %516 = vmatmul.mubr.msk.bf16.vlgmr.msra.gmra.mxu0 %vm326_vm0, %v581_v27 }
  0xa8   : > { %v314_v29 = vpop.permute.xlu0 %313 }
  0xac   : > { %v319_v41 = vpop.permute.xlu0 %318 }
  0xfa   : > { %v364_v32 = vpop.f32.mrf.mxu0 }
  0xfb   : > { %v365_v34 = vadd.f32 %v364_v32, %v314_v29 }
  0xfc   : > { %v366_v36 = vpop.f32.mrf.mxu0 }
  0xfd   : > { %v381_v38 = vadd.f32 %v377_v31, %v365_v34  ;;  %v367_v39 = vadd.f32 %v366_v36, %v314_v29 }
  0xfe   : > { %v368_v42 = vpop.f32.mrf.mxu0 }
  0xff   : > { %385 = vst [vmem:[%s280_s15] sm:$0xff] %v381_v38  ;;  %v382_v43 = vadd.f32 %v378_v35, %v367_v39  ;;  %v369_v44 = vadd.f32 %v368_v42, %v319_v41 }
 0x100   : > { %v370_v46 = vpop.f32.mrf.mxu0 }
 0x101   : > { %386 = vst [vmem:[%s280_s15 + $0x8] sm:$0xff] %v382_v43  ;;  %v383_v47 = vadd.f32 %v379_v40, %v369_v44  ;;  %v371_v48 = vadd.f32 %v370_v46, %v319_v41 }
 0x103   : > { %387 = vst [vmem:[%s280_s15 + $0x10] sm:$0x1f] %v383_v47  ;;  %v384_v49 = vadd.f32 %v380_v45, %v371_v48 }
 0x105   : > { %388 = vst [vmem:[%s280_s15 + $0x18] sm:$0x1f] %v384_v49 }
 0x106 PF: > { %s17_s20 = sadd.s32 1, %s660_s20   ;;  %s825_s15 = smov %s644_s16 }
 0x107   : > { %p14_p8 = scmp.ge.s32.totalorder %s17_s20, 4   ;;  %s826_s16 = smov %s648_s17 }
 0x108   : > { %s827_s17 = smov %s740_s27  ;;  %s828_s18 = smov %s656_s19 }
 0x109   : > { %s829_s19 = smov %s831_s22  ;;  %16 = sbr.rel (!%p14_p8) target bundleno = 4 (0x4), region = 79 }
 0x10e   :  { %419 = vsyncpa [#allocation3], 1 }
 0x10f   :  { %421 = vsyncpa [#allocation3 + $0x1], 1 }

</bundles_post_ra>
